<compile_context>
chip_gen: v5e
topology: v5e:2x2
jax: 0.10.0
libtpu: 0.0.40
codegen_flags: <defaults>
</compile_context>

<pallas_src>
import jax
import jax.numpy as jnp
from jax.experimental import pallas as pl
from jax.experimental.pallas import tpu as pltpu


def _round_up(a, b):
    return (a + b - 1) // b * b


def _vmem_cap_bytes():
    """Upper bound for vmem_limit_bytes, leaving headroom below physical VMEM."""
    try:
        info = pltpu.get_tpu_info()
        cap = int(info.vmem_capacity_bytes) - 16 * 2**20
        return max(16 * 2**20, min(cap, 112 * 2**20))
    except Exception:
        return 48 * 2**20  # safe on v5e / v6e / v7x


def _num_tensorcores():
    """Best-effort TensorCore count per chip (megacore grid balancing)."""
    try:
        info = pltpu.get_tpu_info()
        for attr in ("num_cores", "num_tensorcores", "tensor_cores_per_chip",
                     "cores_per_chip"):
            v = getattr(info, attr, None)
            if v:
                return int(v)
    except Exception:
        pass
    return 1


# -----------------------------------------------------------------------------
# Object-level heads: one fused kernel over row tiles of [N, H].
# -----------------------------------------------------------------------------
def _object_heads_kernel(
    x_ref,                    # [tm, H]                      (compute dtype)
    wx_ref, bx_ref,           # fused L1 + objness: [H, 2Hs+H2s+1], [1, ...]
    bw2_ref, bb2_ref,         # bbox MLP layer 2:   [Hs, Hs], [1, Hs]
    w2f_ref, b2f_ref,         # fused block-diag L2:[2Hs+H2s, C+5], [1, C+5]
    out_ref,                  # packed output:      [tm, OUT_W] f32
):
    Hs = bw2_ref.shape[0]
    H2s = w2f_ref.shape[0] - 2 * Hs
    C = w2f_ref.shape[1] - 5
    wdt = wx_ref.dtype
    f32 = jnp.float32

    x = x_ref[...]
    tm = x.shape[0]

    # ---- fused first layer: [class L1 | bbox L1 | cutting L1 | objectness] --
    pre = jnp.dot(x, wx_ref[...], preferred_element_type=f32) + bx_ref[...]
    obj = pre[:, 2 * Hs + H2s:]                 # [tm, 1]   (no activation)
    h = jnp.maximum(pre[:, :2 * Hs + H2s], 0.0)
    h_cls = h[:, :Hs]
    b1 = h[:, Hs:2 * Hs]
    c1 = h[:, 2 * Hs:]

    # ---- bbox MLP layer 2 ----
    b2 = jnp.maximum(
        jnp.dot(b1.astype(wdt), bw2_ref[...], preferred_element_type=f32)
        + bb2_ref[...], 0.0)

    # ---- fused block-diagonal second layer: [cls | bbox raw | cutting] ----
    # (Dropout(0.1) before the cutting L2 is identity at inference.)
    h2 = jnp.concatenate([h_cls, b2, c1], axis=1).astype(wdt)
    f2 = jnp.dot(h2, w2f_ref[...], preferred_element_type=f32) + b2f_ref[...]
    cls = f2[:, :C]
    braw = f2[:, C:C + 4]
    cut = f2[:, C + 4:C + 5]

    # ---- bbox post-processing: sigmoid(cxcywh) -> clipped xyxy, min size ----
    s = jax.nn.sigmoid(braw)
    cx, cy = s[:, 0:1], s[:, 1:2]
    hw, hh = s[:, 2:3] * 0.5, s[:, 3:4] * 0.5
    x1 = jnp.clip(cx - hw, 0.0, 1.0)
    y1 = jnp.clip(cy - hh, 0.0, 1.0)
    x2 = jnp.maximum(jnp.clip(cx + hw, 0.0, 1.0), x1 + 0.01)
    y2 = jnp.maximum(jnp.clip(cy + hh, 0.0, 1.0), y1 + 0.01)

    # ---- pack heads into a single small output slab (one store) ----
    pad = out_ref.shape[1] - (C + 6)
    pieces = [cls, x1, y1, x2, y2, cut, obj]
    if pad:
        pieces.append(jnp.zeros((tm, pad), f32))
    out_ref[...] = jnp.concatenate(pieces, axis=1).astype(out_ref.dtype)


def object_heads_forward(decoder_output, params, num_classes, *,
                         block_rows=1024, compute_dtype=jnp.bfloat16):
    B, Q, H = decoder_output.shape
    C = num_classes
    H2 = H // 2
    N = B * Q
    f32 = jnp.float32

    # Segment widths padded to a 128-lane boundary at production H (multiple of
    # 128) so in-kernel lane slices are tile-aligned; tiny H stays unpadded.
    lane = 128 if H % 128 == 0 else 8
    Hs = _round_up(H, lane)
    H2s = _round_up(H2, lane)

    def pad_cols(w, width):
        return jnp.pad(w, ((0, 0), (0, width - w.shape[1])))

    # Fused first layer: [cls L1 | bbox L1 | cutting L1 | objectness].
    wx = jnp.concatenate([pad_cols(params["cls_w1"], Hs),
                          pad_cols(params["box_w1"], Hs),
                          pad_cols(params["cut_w1"], H2s),
                          params["obj_w"]], axis=1)
    bx = jnp.concatenate([pad_cols(params["cls_b1"], Hs),
                          pad_cols(params["box_b1"], Hs),
                          pad_cols(params["cut_b1"], H2s),
                          params["obj_b"]], axis=1)

    # bbox MLP layer 2 padded to the aligned segment width (zero pad = no-op).
    bw2 = jnp.pad(params["box_w2"], ((0, Hs - H), (0, Hs - H)))
    bb2 = pad_cols(params["box_b2"], Hs)

    # Fused block-diagonal second layer applied to concat(h_cls, b2, c1).
    w2f = jnp.zeros((2 * Hs + H2s, C + 5), f32)
    w2f = w2f.at[:H, :C].set(params["cls_w2"])
    w2f = w2f.at[Hs:Hs + H, C:C + 4].set(params["box_w3"])
    w2f = w2f.at[2 * Hs:2 * Hs + H2, C + 4:].set(params["cut_w2"])
    b2f = jnp.concatenate([params["cls_b2"], params["box_b3"],
                           params["cut_b2"]], axis=1)

    weight_args = (wx.astype(compute_dtype), bx.astype(f32),
                   bw2.astype(compute_dtype), bb2.astype(f32),
                   w2f.astype(compute_dtype), b2f.astype(f32))

    # ---- row tiling: big tiles, minimal padding, bf16-friendly multiples ----
    n_cores = _num_tensorcores()
    n_steps = max(1, pl.cdiv(N, block_rows))
    if n_cores > 1:
        n_steps = _round_up(n_steps, n_cores)      # balanced megacore grid
    tm = _round_up(pl.cdiv(N, n_steps), 16)        # 16: bf16 sublane pack
    grid_n = pl.cdiv(N, tm)
    N_pad = grid_n * tm

    x = decoder_output.reshape(N, H).astype(compute_dtype)
    if N_pad != N:
        x = jnp.pad(x, ((0, N_pad - N), (0, 0)))

    # Small full-array output width (cuts HBM writeback ~8-12x vs a 128 slab).
    OUT_W = max(8, _round_up(C + 6, 8))

    # Advisory cost estimate for XLA scheduling.
    flops = (2 * N_pad * H * (2 * Hs + H2s + 1)
             + 2 * N_pad * Hs * Hs
             + 2 * N_pad * (2 * Hs + H2s) * (C + 5))
    weight_bytes = sum(int(w.size) * w.dtype.itemsize for w in weight_args)
    bytes_acc = (int(x.size) * x.dtype.itemsize + weight_bytes
                 + N_pad * OUT_W * 4)
    cost = pl.CostEstimate(flops=flops, transcendentals=4 * N_pad,
                           bytes_accessed=bytes_acc)

    # VMEM budget: double-buffered x/out tiles + single-buffered weights,
    # capped below physical VMEM (critical on v7x's 64 MiB).
    itemsize = jnp.dtype(compute_dtype).itemsize
    est = 2 * tm * (H * itemsize + OUT_W * 4) + weight_bytes
    vmem_limit = int(min(_vmem_cap_bytes(), max(32 * 2**20, 2 * est)))

    x_spec = pl.BlockSpec((tm, H), lambda i: (i, 0))
    out_spec = pl.BlockSpec((tm, OUT_W), lambda i: (i, 0))

    def _call(single_buffer_consts):
        def const_spec(w):
            if single_buffer_consts:
                return pl.BlockSpec(w.shape, lambda i: (0,) * w.ndim,
                                    pipeline_mode=pl.Buffered(1))
            return pl.BlockSpec(w.shape, lambda i: (0,) * w.ndim)

        return pl.pallas_call(
            _object_heads_kernel,
            out_shape=jax.ShapeDtypeStruct((N_pad, OUT_W), f32),
            grid=(grid_n,),
            in_specs=[x_spec] + [const_spec(w) for w in weight_args],
            out_specs=out_spec,
            compiler_params=pltpu.CompilerParams(
                dimension_semantics=("parallel",),
                vmem_limit_bytes=vmem_limit),
            cost_estimate=cost,
        )(x, *weight_args)

    try:
        out = _call(True)      # single-buffered constant weights (saves VMEM)
    except Exception:          # fallback if pipeline_mode=Buffered(1) rejected
        out = _call(False)

    out = out[:N]
    return {
        "pred_logits": out[:, :C].reshape(B, Q, C),
        "pred_boxes": out[:, C:C + 4].reshape(B, Q, 4),
        "pred_cutting": out[:, C + 4:C + 5].reshape(B, Q, 1),
        "pred_objectness": out[:, C + 5:C + 6].reshape(B, Q, 1),
    }


# -----------------------------------------------------------------------------
# Sequence-level head:
# Linear -> LayerNorm -> ReLU -> (Dropout) -> Linear -> LayerNorm -> ReLU ->
# (Dropout) -> Linear.  Left to plain XLA per the perf review: a separate
# pallas_call launch + weight DMAs cost more than this [B, H] head's compute.
# -----------------------------------------------------------------------------
def _layernorm(x, gamma, beta, eps=1e-5):
    mean = jnp.mean(x, axis=-1, keepdims=True)
    var = jnp.mean((x - mean) ** 2, axis=-1, keepdims=True)  # biased, like torch
    return (x - mean) * jax.lax.rsqrt(var + eps) * gamma + beta


def sequence_head_forward(aggregated_features, params):
    a = aggregated_features.astype(jnp.float32)
    h = a @ params["seq_w1"] + params["seq_b1"]
    h = jnp.maximum(_layernorm(h, params["seq_g1"], params["seq_be1"]), 0.0)
    # Dropout(0.2): identity at inference
    h = h @ params["seq_w2"] + params["seq_b2"]
    h = jnp.maximum(_layernorm(h, params["seq_g2"], params["seq_be2"]), 0.0)
    # Dropout(0.1): identity at inference
    return h @ params["seq_w3"] + params["seq_b3"]


def combined_detection_heads(decoder_output, aggregated_features, params,
                             num_classes=4, *, block_rows=1024,
                             compute_dtype=jnp.bfloat16):
    preds = object_heads_forward(decoder_output, params, num_classes,
                                 block_rows=block_rows,
                                 compute_dtype=compute_dtype)
    preds["sequence_cutting"] = sequence_head_forward(aggregated_features, params)
    return preds


# -----------------------------------------------------------------------------
# Deterministic parameter init (synthetic, not a checkpoint load)
# -----------------------------------------------------------------------------
def init_params(key, hidden_dim, num_classes):
    H = hidden_dim
    H2 = H // 2
    H4 = H // 4
    keys = iter(jax.random.split(key, 64))

    def lin(din, dout):
        w = jax.random.normal(next(keys), (din, dout), jnp.float32) * 0.1
        b = jax.random.normal(next(keys), (1, dout), jnp.float32) * 0.1
        return w, b

    p = {}
    # class head
    p["cls_w1"], p["cls_b1"] = lin(H, H)
    p["cls_w2"], p["cls_b2"] = lin(H, num_classes)
    # bbox MLP (3 layers: H->H->H->4)
    p["box_w1"], p["box_b1"] = lin(H, H)
    p["box_w2"], p["box_b2"] = lin(H, H)
    p["box_w3"], p["box_b3"] = lin(H, 4)
    # cutting head
    p["cut_w1"], p["cut_b1"] = lin(H, H2)
    p["cut_w2"], p["cut_b2"] = lin(H2, 1)
    # objectness head
    p["obj_w"], p["obj_b"] = lin(H, 1)
    # sequence head
    p["seq_w1"], p["seq_b1"] = lin(H, H2)
    p["seq_g1"] = jnp.ones((1, H2), jnp.float32)
    p["seq_be1"] = jnp.zeros((1, H2), jnp.float32)
    p["seq_w2"], p["seq_b2"] = lin(H2, H4)
    p["seq_g2"] = jnp.ones((1, H4), jnp.float32)
    p["seq_be2"] = jnp.zeros((1, H4), jnp.float32)
    p["seq_w3"], p["seq_b3"] = lin(H4, 1)
    return p


# -----------------------------------------------------------------------------
# Pure-JAX reference (for correctness checks in __main__)
# -----------------------------------------------------------------------------
def reference_forward(decoder_output, aggregated_features, p, num_classes):
    x = decoder_output
    relu = lambda v: jnp.maximum(v, 0.0)

    cls = relu(x @ p["cls_w1"] + p["cls_b1"]) @ p["cls_w2"] + p["cls_b2"]

    b = relu(x @ p["box_w1"] + p["box_b1"])
    b = relu(b @ p["box_w2"] + p["box_b2"])
    braw = b @ p["box_w3"] + p["box_b3"]
    s = jax.nn.sigmoid(braw)
    cx, cy, w, h = s[..., 0], s[..., 1], s[..., 2], s[..., 3]
    x1 = jnp.clip(cx - w / 2, 0.0, 1.0)
    y1 = jnp.clip(cy - h / 2, 0.0, 1.0)
    x2 = jnp.maximum(jnp.clip(cx + w / 2, 0.0, 1.0), x1 + 0.01)
    y2 = jnp.maximum(jnp.clip(cy + h / 2, 0.0, 1.0), y1 + 0.01)
    box = jnp.stack([x1, y1, x2, y2], axis=-1)

    cut = relu(x @ p["cut_w1"] + p["cut_b1"]) @ p["cut_w2"] + p["cut_b2"]
    obj = x @ p["obj_w"] + p["obj_b"]

    a = aggregated_features
    h1 = a @ p["seq_w1"] + p["seq_b1"]
    h1 = relu(_layernorm(h1, p["seq_g1"], p["seq_be1"]))
    h2 = h1 @ p["seq_w2"] + p["seq_b2"]
    h2 = relu(_layernorm(h2, p["seq_g2"], p["seq_be2"]))
    seq = h2 @ p["seq_w3"] + p["seq_b3"]

    return {
        "pred_logits": cls,
        "pred_boxes": box,
        "pred_cutting": cut,
        "pred_objectness": obj,
        "sequence_cutting": seq,
    }


if __name__ == "__main__":
    B, Q, H, C = 2, 8, 32, 4   # small shapes: batch=2, num_queries=8, hidden=32

    key = jax.random.PRNGKey(0)
    k_dec, k_agg, k_par = jax.random.split(key, 3)
    decoder_output = jax.random.normal(k_dec, (B, Q, H), jnp.float32)
    aggregated_features = jax.random.normal(k_agg, (B, H), jnp.float32)
    params = init_params(k_par, H, C)

    ref = reference_forward(decoder_output, aggregated_features, params, C)

    # f32 weights/activations: must match the reference tightly.
    preds = combined_detection_heads(decoder_output, aggregated_features, params,
                                     num_classes=C, compute_dtype=jnp.float32)
    preds = jax.tree_util.tree_map(jax.block_until_ready, preds)
    for name in ("pred_logits", "pred_boxes", "pred_cutting",
                 "pred_objectness", "sequence_cutting"):
        assert preds[name].shape == ref[name].shape, name
        assert jnp.allclose(preds[name], ref[name], atol=1e-4, rtol=1e-4), name

    # Default bf16 weights/activations with f32 accumulation (production MXU
    # path): looser tolerance vs. the f32 reference.
    preds_bf16 = combined_detection_heads(decoder_output, aggregated_features,
                                          params, num_classes=C)
    preds_bf16 = jax.tree_util.tree_map(jax.block_until_ready, preds_bf16)
    for name in ("pred_logits", "pred_boxes", "pred_cutting", "pred_objectness"):
        assert preds_bf16[name].shape == ref[name].shape, name
        assert jnp.allclose(preds_bf16[name], ref[name],
                            atol=7.5e-2, rtol=7.5e-2), name

    print("KERNEL_OK")
</pallas_src>

<mosaic_0001>
module attributes {stable_mosaic.version = 11 : i64} {
  func.func @_object_heads_kernel(%arg0: i32, %arg1: memref<16x32xf32, #tpu.memory_space<vmem>>, %arg2: memref<32x81xf32, #tpu.memory_space<vmem>>, %arg3: memref<1x81xf32, #tpu.memory_space<vmem>>, %arg4: memref<32x32xf32, #tpu.memory_space<vmem>>, %arg5: memref<1x32xf32, #tpu.memory_space<vmem>>, %arg6: memref<80x9xf32, #tpu.memory_space<vmem>>, %arg7: memref<1x9xf32, #tpu.memory_space<vmem>>, %arg8: memref<16x16xf32, #tpu.memory_space<vmem>>) attributes {dimension_semantics = [#tpu.dimension_semantics<parallel>], iteration_bounds = array<i64: 1>, scalar_prefetch = 0 : i64, scratch_operands = 0 : i64, tpu.core_type = #tpu.core_type<tc>, window_params = [{transform_indices = @transform_0, window_bounds = array<i64: 16, 32>}, {pipeline_mode = #tpu.pipeline_mode<synchronous>, transform_indices = @transform_1, window_bounds = array<i64: 32, 81>}, {pipeline_mode = #tpu.pipeline_mode<synchronous>, transform_indices = @transform_2, window_bounds = array<i64: 1, 81>}, {pipeline_mode = #tpu.pipeline_mode<synchronous>, transform_indices = @transform_3, window_bounds = array<i64: 32, 32>}, {pipeline_mode = #tpu.pipeline_mode<synchronous>, transform_indices = @transform_4, window_bounds = array<i64: 1, 32>}, {pipeline_mode = #tpu.pipeline_mode<synchronous>, transform_indices = @transform_5, window_bounds = array<i64: 80, 9>}, {pipeline_mode = #tpu.pipeline_mode<synchronous>, transform_indices = @transform_6, window_bounds = array<i64: 1, 9>}, {transform_indices = @transform_7, window_bounds = array<i64: 16, 16>}]} {
    %c0 = arith.constant 0 : index
    %c0_0 = arith.constant 0 : index
    %0 = vector.load %arg1[%c0, %c0_0] : memref<16x32xf32, #tpu.memory_space<vmem>>, vector<16x32xf32>
    %c0_1 = arith.constant 0 : index
    %c0_2 = arith.constant 0 : index
    %1 = vector.load %arg2[%c0_1, %c0_2] : memref<32x81xf32, #tpu.memory_space<vmem>>, vector<32x81xf32>
    %cst = arith.constant dense<0.000000e+00> : vector<16x81xf32>
    %2 = tpu.matmul %0, %1, %cst {dimension_numbers = #tpu.dot_dimension_numbers<[1], [0], [0], [1], [0, 0, 1, 1], [], []>} : vector<16x32xf32>, vector<32x81xf32>, vector<16x81xf32> -> vector<16x81xf32>
    %c0_3 = arith.constant 0 : index
    %c0_4 = arith.constant 0 : index
    %3 = vector.load %arg3[%c0_3, %c0_4] : memref<1x81xf32, #tpu.memory_space<vmem>>, vector<1x81xf32>
    %4 = vector.broadcast %3 : vector<1x81xf32> to vector<16x81xf32>
    %5 = arith.addf %2, %4 : vector<16x81xf32>
    %6 = vector.extract_strided_slice %5 {offsets = [0, 80], sizes = [16, 1], strides = [1, 1]} : vector<16x81xf32> to vector<16x1xf32>
    %7 = vector.extract_strided_slice %5 {offsets = [0, 0], sizes = [16, 80], strides = [1, 1]} : vector<16x81xf32> to vector<16x80xf32>
    %cst_5 = arith.constant 0.000000e+00 : f32
    %8 = vector.broadcast %cst_5 : f32 to vector<16x80xf32>
    %9 = arith.maximumf %7, %8 : vector<16x80xf32>
    %10 = vector.extract_strided_slice %9 {offsets = [0, 0], sizes = [16, 32], strides = [1, 1]} : vector<16x80xf32> to vector<16x32xf32>
    %11 = vector.extract_strided_slice %9 {offsets = [0, 32], sizes = [16, 32], strides = [1, 1]} : vector<16x80xf32> to vector<16x32xf32>
    %12 = vector.extract_strided_slice %9 {offsets = [0, 64], sizes = [16, 16], strides = [1, 1]} : vector<16x80xf32> to vector<16x16xf32>
    %c0_6 = arith.constant 0 : index
    %c0_7 = arith.constant 0 : index
    %13 = vector.load %arg4[%c0_6, %c0_7] : memref<32x32xf32, #tpu.memory_space<vmem>>, vector<32x32xf32>
    %cst_8 = arith.constant dense<0.000000e+00> : vector<16x32xf32>
    %14 = tpu.matmul %11, %13, %cst_8 {dimension_numbers = #tpu.dot_dimension_numbers<[1], [0], [0], [1], [0, 0, 1, 1], [], []>} : vector<16x32xf32>, vector<32x32xf32>, vector<16x32xf32> -> vector<16x32xf32>
    %c0_9 = arith.constant 0 : index
    %c0_10 = arith.constant 0 : index
    %15 = vector.load %arg5[%c0_9, %c0_10] : memref<1x32xf32, #tpu.memory_space<vmem>>, vector<1x32xf32>
    %16 = vector.broadcast %15 : vector<1x32xf32> to vector<16x32xf32>
    %17 = arith.addf %14, %16 : vector<16x32xf32>
    %cst_11 = arith.constant 0.000000e+00 : f32
    %18 = vector.broadcast %cst_11 : f32 to vector<16x32xf32>
    %19 = arith.maximumf %17, %18 : vector<16x32xf32>
    %20 = tpu.concatenate %10, %19, %12 in 1 : vector<16x32xf32>, vector<16x32xf32>, vector<16x16xf32> -> vector<16x80xf32>
    %c0_12 = arith.constant 0 : index
    %c0_13 = arith.constant 0 : index
    %21 = vector.load %arg6[%c0_12, %c0_13] : memref<80x9xf32, #tpu.memory_space<vmem>>, vector<80x9xf32>
    %cst_14 = arith.constant dense<0.000000e+00> : vector<16x9xf32>
    %22 = tpu.matmul %20, %21, %cst_14 {dimension_numbers = #tpu.dot_dimension_numbers<[1], [0], [0], [1], [0, 0, 1, 1], [], []>} : vector<16x80xf32>, vector<80x9xf32>, vector<16x9xf32> -> vector<16x9xf32>
    %c0_15 = arith.constant 0 : index
    %c0_16 = arith.constant 0 : index
    %23 = vector.load %arg7[%c0_15, %c0_16] : memref<1x9xf32, #tpu.memory_space<vmem>>, vector<1x9xf32>
    %24 = vector.broadcast %23 : vector<1x9xf32> to vector<16x9xf32>
    %25 = arith.addf %22, %24 : vector<16x9xf32>
    %26 = vector.extract_strided_slice %25 {offsets = [0, 0], sizes = [16, 4], strides = [1, 1]} : vector<16x9xf32> to vector<16x4xf32>
    %27 = vector.extract_strided_slice %25 {offsets = [0, 4], sizes = [16, 4], strides = [1, 1]} : vector<16x9xf32> to vector<16x4xf32>
    %28 = vector.extract_strided_slice %25 {offsets = [0, 8], sizes = [16, 1], strides = [1, 1]} : vector<16x9xf32> to vector<16x1xf32>
    %29 = arith.negf %27 : vector<16x4xf32>
    %30 = math.exp %29 : vector<16x4xf32>
    %cst_17 = arith.constant 1.000000e+00 : f32
    %31 = vector.broadcast %cst_17 : f32 to vector<16x4xf32>
    %32 = arith.addf %31, %30 : vector<16x4xf32>
    %33 = arith.divf %31, %32 : vector<16x4xf32>
    %34 = vector.extract_strided_slice %33 {offsets = [0, 0], sizes = [16, 1], strides = [1, 1]} : vector<16x4xf32> to vector<16x1xf32>
    %35 = vector.extract_strided_slice %33 {offsets = [0, 1], sizes = [16, 1], strides = [1, 1]} : vector<16x4xf32> to vector<16x1xf32>
    %36 = vector.extract_strided_slice %33 {offsets = [0, 2], sizes = [16, 1], strides = [1, 1]} : vector<16x4xf32> to vector<16x1xf32>
    %cst_18 = arith.constant 5.000000e-01 : f32
    %37 = vector.broadcast %cst_18 : f32 to vector<16x1xf32>
    %38 = arith.mulf %36, %37 : vector<16x1xf32>
    %39 = vector.extract_strided_slice %33 {offsets = [0, 3], sizes = [16, 1], strides = [1, 1]} : vector<16x4xf32> to vector<16x1xf32>
    %cst_19 = arith.constant 5.000000e-01 : f32
    %40 = vector.broadcast %cst_19 : f32 to vector<16x1xf32>
    %41 = arith.mulf %39, %40 : vector<16x1xf32>
    %42 = arith.subf %34, %38 : vector<16x1xf32>
    %cst_20 = arith.constant 0.000000e+00 : f32
    %cst_21 = arith.constant 1.000000e+00 : f32
    %43 = vector.broadcast %cst_20 : f32 to vector<16x1xf32>
    %44 = arith.maximumf %43, %42 : vector<16x1xf32>
    %45 = vector.broadcast %cst_21 : f32 to vector<16x1xf32>
    %46 = arith.minimumf %45, %44 : vector<16x1xf32>
    %47 = arith.subf %35, %41 : vector<16x1xf32>
    %cst_22 = arith.constant 0.000000e+00 : f32
    %cst_23 = arith.constant 1.000000e+00 : f32
    %48 = vector.broadcast %cst_22 : f32 to vector<16x1xf32>
    %49 = arith.maximumf %48, %47 : vector<16x1xf32>
    %50 = vector.broadcast %cst_23 : f32 to vector<16x1xf32>
    %51 = arith.minimumf %50, %49 : vector<16x1xf32>
    %52 = arith.addf %34, %38 : vector<16x1xf32>
    %cst_24 = arith.constant 0.000000e+00 : f32
    %cst_25 = arith.constant 1.000000e+00 : f32
    %53 = vector.broadcast %cst_24 : f32 to vector<16x1xf32>
    %54 = arith.maximumf %53, %52 : vector<16x1xf32>
    %55 = vector.broadcast %cst_25 : f32 to vector<16x1xf32>
    %56 = arith.minimumf %55, %54 : vector<16x1xf32>
    %cst_26 = arith.constant 0.00999999977 : f32
    %57 = vector.broadcast %cst_26 : f32 to vector<16x1xf32>
    %58 = arith.addf %46, %57 : vector<16x1xf32>
    %59 = arith.maximumf %56, %58 : vector<16x1xf32>
    %60 = arith.addf %35, %41 : vector<16x1xf32>
    %cst_27 = arith.constant 0.000000e+00 : f32
    %cst_28 = arith.constant 1.000000e+00 : f32
    %61 = vector.broadcast %cst_27 : f32 to vector<16x1xf32>
    %62 = arith.maximumf %61, %60 : vector<16x1xf32>
    %63 = vector.broadcast %cst_28 : f32 to vector<16x1xf32>
    %64 = arith.minimumf %63, %62 : vector<16x1xf32>
    %cst_29 = arith.constant 0.00999999977 : f32
    %65 = vector.broadcast %cst_29 : f32 to vector<16x1xf32>
    %66 = arith.addf %51, %65 : vector<16x1xf32>
    %67 = arith.maximumf %64, %66 : vector<16x1xf32>
    %cst_30 = arith.constant 0.000000e+00 : f32
    %68 = vector.broadcast %cst_30 : f32 to vector<16x6xf32>
    %69 = tpu.concatenate %26, %46, %51, %59, %67, %28, %6, %68 in 1 : vector<16x4xf32>, vector<16x1xf32>, vector<16x1xf32>, vector<16x1xf32>, vector<16x1xf32>, vector<16x1xf32>, vector<16x1xf32>, vector<16x6xf32> -> vector<16x16xf32>
    %c0_31 = arith.constant 0 : index
    %c0_32 = arith.constant 0 : index
    %70 = vector.load %arg8[%c0_31, %c0_32] : memref<16x16xf32, #tpu.memory_space<vmem>>, vector<16x16xf32>
    tpu.vector_store %arg8[%c0_31, %c0_32], %69 {strides = array<i32>} : memref<16x16xf32, #tpu.memory_space<vmem>>, vector<16x16xf32>,
    return
  }
  func.func @transform_0(%arg0: i32) -> (i32, i32) {
    %c0_i32 = arith.constant 0 : i32
    %c0_i32_0 = arith.constant 0 : i32
    return %arg0, %c0_i32 : i32, i32
  }
  func.func @transform_1(%arg0: i32) -> (i32, i32) {
    %c0_i32 = arith.constant 0 : i32
    %c0_i32_0 = arith.constant 0 : i32
    %c0_i32_1 = arith.constant 0 : i32
    return %c0_i32, %c0_i32_0 : i32, i32
  }
  func.func @transform_2(%arg0: i32) -> (i32, i32) {
    %c0_i32 = arith.constant 0 : i32
    %c0_i32_0 = arith.constant 0 : i32
    %c0_i32_1 = arith.constant 0 : i32
    return %c0_i32, %c0_i32_0 : i32, i32
  }
  func.func @transform_3(%arg0: i32) -> (i32, i32) {
    %c0_i32 = arith.constant 0 : i32
    %c0_i32_0 = arith.constant 0 : i32
    %c0_i32_1 = arith.constant 0 : i32
    return %c0_i32, %c0_i32_0 : i32, i32
  }
  func.func @transform_4(%arg0: i32) -> (i32, i32) {
    %c0_i32 = arith.constant 0 : i32
    %c0_i32_0 = arith.constant 0 : i32
    %c0_i32_1 = arith.constant 0 : i32
    return %c0_i32, %c0_i32_0 : i32, i32
  }
  func.func @transform_5(%arg0: i32) -> (i32, i32) {
    %c0_i32 = arith.constant 0 : i32
    %c0_i32_0 = arith.constant 0 : i32
    %c0_i32_1 = arith.constant 0 : i32
    return %c0_i32, %c0_i32_0 : i32, i32
  }
  func.func @transform_6(%arg0: i32) -> (i32, i32) {
    %c0_i32 = arith.constant 0 : i32
    %c0_i32_0 = arith.constant 0 : i32
    %c0_i32_1 = arith.constant 0 : i32
    return %c0_i32, %c0_i32_0 : i32, i32
  }
  func.func @transform_7(%arg0: i32) -> (i32, i32) {
    %c0_i32 = arith.constant 0 : i32
    %c0_i32_0 = arith.constant 0 : i32
    return %arg0, %c0_i32 : i32, i32
  }
}

module attributes {stable_mosaic.version = 11 : i64} {
  func.func @_object_heads_kernel(%arg0: i32, %arg1: memref<16x32xf32, #tpu.memory_space<vmem>>, %arg2: memref<32x81xf32, #tpu.memory_space<vmem>>, %arg3: memref<1x81xf32, #tpu.memory_space<vmem>>, %arg4: memref<32x32xf32, #tpu.memory_space<vmem>>, %arg5: memref<1x32xf32, #tpu.memory_space<vmem>>, %arg6: memref<80x9xf32, #tpu.memory_space<vmem>>, %arg7: memref<1x9xf32, #tpu.memory_space<vmem>>, %arg8: memref<16x16xf32, #tpu.memory_space<vmem>>) attributes {dimension_semantics = [#tpu.dimension_semantics<parallel>], iteration_bounds = array<i64: 1>, scalar_prefetch = 0 : i64, scratch_operands = 0 : i64, tpu.core_type = #tpu.core_type<tc>, window_params = [{transform_indices = @transform_0, window_bounds = array<i64: 16, 32>}, {pipeline_mode = #tpu.pipeline_mode<synchronous>, transform_indices = @transform_1, window_bounds = array<i64: 32, 81>}, {pipeline_mode = #tpu.pipeline_mode<synchronous>, transform_indices = @transform_2, window_bounds = array<i64: 1, 81>}, {pipeline_mode = #tpu.pipeline_mode<synchronous>, transform_indices = @transform_3, window_bounds = array<i64: 32, 32>}, {pipeline_mode = #tpu.pipeline_mode<synchronous>, transform_indices = @transform_4, window_bounds = array<i64: 1, 32>}, {pipeline_mode = #tpu.pipeline_mode<synchronous>, transform_indices = @transform_5, window_bounds = array<i64: 80, 9>}, {pipeline_mode = #tpu.pipeline_mode<synchronous>, transform_indices = @transform_6, window_bounds = array<i64: 1, 9>}, {transform_indices = @transform_7, window_bounds = array<i64: 16, 16>}]} {
    %c0 = arith.constant 0 : index
    %c0_0 = arith.constant 0 : index
    %0 = vector.load %arg1[%c0, %c0_0] : memref<16x32xf32, #tpu.memory_space<vmem>>, vector<16x32xf32>
    %c0_1 = arith.constant 0 : index
    %c0_2 = arith.constant 0 : index
    %1 = vector.load %arg2[%c0_1, %c0_2] : memref<32x81xf32, #tpu.memory_space<vmem>>, vector<32x81xf32>
    %cst = arith.constant dense<0.000000e+00> : vector<16x81xf32>
    %2 = tpu.matmul %0, %1, %cst {dimension_numbers = #tpu.dot_dimension_numbers<[1], [0], [0], [1], [0, 0, 1, 1], [], []>} : vector<16x32xf32>, vector<32x81xf32>, vector<16x81xf32> -> vector<16x81xf32>
    %c0_3 = arith.constant 0 : index
    %c0_4 = arith.constant 0 : index
    %3 = vector.load %arg3[%c0_3, %c0_4] : memref<1x81xf32, #tpu.memory_space<vmem>>, vector<1x81xf32>
    %4 = vector.broadcast %3 : vector<1x81xf32> to vector<16x81xf32>
    %5 = arith.addf %2, %4 : vector<16x81xf32>
    %6 = vector.extract_strided_slice %5 {offsets = [0, 80], sizes = [16, 1], strides = [1, 1]} : vector<16x81xf32> to vector<16x1xf32>
    %7 = vector.extract_strided_slice %5 {offsets = [0, 0], sizes = [16, 80], strides = [1, 1]} : vector<16x81xf32> to vector<16x80xf32>
    %cst_5 = arith.constant 0.000000e+00 : f32
    %8 = vector.broadcast %cst_5 : f32 to vector<16x80xf32>
    %9 = arith.maximumf %7, %8 : vector<16x80xf32>
    %10 = vector.extract_strided_slice %9 {offsets = [0, 0], sizes = [16, 32], strides = [1, 1]} : vector<16x80xf32> to vector<16x32xf32>
    %11 = vector.extract_strided_slice %9 {offsets = [0, 32], sizes = [16, 32], strides = [1, 1]} : vector<16x80xf32> to vector<16x32xf32>
    %12 = vector.extract_strided_slice %9 {offsets = [0, 64], sizes = [16, 16], strides = [1, 1]} : vector<16x80xf32> to vector<16x16xf32>
    %c0_6 = arith.constant 0 : index
    %c0_7 = arith.constant 0 : index
    %13 = vector.load %arg4[%c0_6, %c0_7] : memref<32x32xf32, #tpu.memory_space<vmem>>, vector<32x32xf32>
    %cst_8 = arith.constant dense<0.000000e+00> : vector<16x32xf32>
    %14 = tpu.matmul %11, %13, %cst_8 {dimension_numbers = #tpu.dot_dimension_numbers<[1], [0], [0], [1], [0, 0, 1, 1], [], []>} : vector<16x32xf32>, vector<32x32xf32>, vector<16x32xf32> -> vector<16x32xf32>
    %c0_9 = arith.constant 0 : index
    %c0_10 = arith.constant 0 : index
    %15 = vector.load %arg5[%c0_9, %c0_10] : memref<1x32xf32, #tpu.memory_space<vmem>>, vector<1x32xf32>
    %16 = vector.broadcast %15 : vector<1x32xf32> to vector<16x32xf32>
    %17 = arith.addf %14, %16 : vector<16x32xf32>
    %cst_11 = arith.constant 0.000000e+00 : f32
    %18 = vector.broadcast %cst_11 : f32 to vector<16x32xf32>
    %19 = arith.maximumf %17, %18 : vector<16x32xf32>
    %20 = tpu.concatenate %10, %19, %12 in 1 : vector<16x32xf32>, vector<16x32xf32>, vector<16x16xf32> -> vector<16x80xf32>
    %c0_12 = arith.constant 0 : index
    %c0_13 = arith.constant 0 : index
    %21 = vector.load %arg6[%c0_12, %c0_13] : memref<80x9xf32, #tpu.memory_space<vmem>>, vector<80x9xf32>
    %cst_14 = arith.constant dense<0.000000e+00> : vector<16x9xf32>
    %22 = tpu.matmul %20, %21, %cst_14 {dimension_numbers = #tpu.dot_dimension_numbers<[1], [0], [0], [1], [0, 0, 1, 1], [], []>} : vector<16x80xf32>, vector<80x9xf32>, vector<16x9xf32> -> vector<16x9xf32>
    %c0_15 = arith.constant 0 : index
    %c0_16 = arith.constant 0 : index
    %23 = vector.load %arg7[%c0_15, %c0_16] : memref<1x9xf32, #tpu.memory_space<vmem>>, vector<1x9xf32>
    %24 = vector.broadcast %23 : vector<1x9xf32> to vector<16x9xf32>
    %25 = arith.addf %22, %24 : vector<16x9xf32>
    %26 = vector.extract_strided_slice %25 {offsets = [0, 0], sizes = [16, 4], strides = [1, 1]} : vector<16x9xf32> to vector<16x4xf32>
    %27 = vector.extract_strided_slice %25 {offsets = [0, 4], sizes = [16, 4], strides = [1, 1]} : vector<16x9xf32> to vector<16x4xf32>
    %28 = vector.extract_strided_slice %25 {offsets = [0, 8], sizes = [16, 1], strides = [1, 1]} : vector<16x9xf32> to vector<16x1xf32>
    %29 = arith.negf %27 : vector<16x4xf32>
    %30 = math.exp %29 : vector<16x4xf32>
    %cst_17 = arith.constant 1.000000e+00 : f32
    %31 = vector.broadcast %cst_17 : f32 to vector<16x4xf32>
    %32 = arith.addf %31, %30 : vector<16x4xf32>
    %33 = arith.divf %31, %32 : vector<16x4xf32>
    %34 = vector.extract_strided_slice %33 {offsets = [0, 0], sizes = [16, 1], strides = [1, 1]} : vector<16x4xf32> to vector<16x1xf32>
    %35 = vector.extract_strided_slice %33 {offsets = [0, 1], sizes = [16, 1], strides = [1, 1]} : vector<16x4xf32> to vector<16x1xf32>
    %36 = vector.extract_strided_slice %33 {offsets = [0, 2], sizes = [16, 1], strides = [1, 1]} : vector<16x4xf32> to vector<16x1xf32>
    %cst_18 = arith.constant 5.000000e-01 : f32
    %37 = vector.broadcast %cst_18 : f32 to vector<16x1xf32>
    %38 = arith.mulf %36, %37 : vector<16x1xf32>
    %39 = vector.extract_strided_slice %33 {offsets = [0, 3], sizes = [16, 1], strides = [1, 1]} : vector<16x4xf32> to vector<16x1xf32>
    %cst_19 = arith.constant 5.000000e-01 : f32
    %40 = vector.broadcast %cst_19 : f32 to vector<16x1xf32>
    %41 = arith.mulf %39, %40 : vector<16x1xf32>
    %42 = arith.subf %34, %38 : vector<16x1xf32>
    %cst_20 = arith.constant 0.000000e+00 : f32
    %cst_21 = arith.constant 1.000000e+00 : f32
    %43 = vector.broadcast %cst_20 : f32 to vector<16x1xf32>
    %44 = arith.maximumf %43, %42 : vector<16x1xf32>
    %45 = vector.broadcast %cst_21 : f32 to vector<16x1xf32>
    %46 = arith.minimumf %45, %44 : vector<16x1xf32>
    %47 = arith.subf %35, %41 : vector<16x1xf32>
    %cst_22 = arith.constant 0.000000e+00 : f32
    %cst_23 = arith.constant 1.000000e+00 : f32
    %48 = vector.broadcast %cst_22 : f32 to vector<16x1xf32>
    %49 = arith.maximumf %48, %47 : vector<16x1xf32>
    %50 = vector.broadcast %cst_23 : f32 to vector<16x1xf32>
    %51 = arith.minimumf %50, %49 : vector<16x1xf32>
    %52 = arith.addf %34, %38 : vector<16x1xf32>
    %cst_24 = arith.constant 0.000000e+00 : f32
    %cst_25 = arith.constant 1.000000e+00 : f32
    %53 = vector.broadcast %cst_24 : f32 to vector<16x1xf32>
    %54 = arith.maximumf %53, %52 : vector<16x1xf32>
    %55 = vector.broadcast %cst_25 : f32 to vector<16x1xf32>
    %56 = arith.minimumf %55, %54 : vector<16x1xf32>
    %cst_26 = arith.constant 0.00999999977 : f32
    %57 = vector.broadcast %cst_26 : f32 to vector<16x1xf32>
    %58 = arith.addf %46, %57 : vector<16x1xf32>
    %59 = arith.maximumf %56, %58 : vector<16x1xf32>
    %60 = arith.addf %35, %41 : vector<16x1xf32>
    %cst_27 = arith.constant 0.000000e+00 : f32
    %cst_28 = arith.constant 1.000000e+00 : f32
    %61 = vector.broadcast %cst_27 : f32 to vector<16x1xf32>
    %62 = arith.maximumf %61, %60 : vector<16x1xf32>
    %63 = vector.broadcast %cst_28 : f32 to vector<16x1xf32>
    %64 = arith.minimumf %63, %62 : vector<16x1xf32>
    %cst_29 = arith.constant 0.00999999977 : f32
    %65 = vector.broadcast %cst_29 : f32 to vector<16x1xf32>
    %66 = arith.addf %51, %65 : vector<16x1xf32>
    %67 = arith.maximumf %64, %66 : vector<16x1xf32>
    %cst_30 = arith.constant 0.000000e+00 : f32
    %68 = vector.broadcast %cst_30 : f32 to vector<16x6xf32>
    %69 = tpu.concatenate %26, %46, %51, %59, %67, %28, %6, %68 in 1 : vector<16x4xf32>, vector<16x1xf32>, vector<16x1xf32>, vector<16x1xf32>, vector<16x1xf32>, vector<16x1xf32>, vector<16x1xf32>, vector<16x6xf32> -> vector<16x16xf32>
    %c0_31 = arith.constant 0 : index
    %c0_32 = arith.constant 0 : index
    %70 = vector.load %arg8[%c0_31, %c0_32] : memref<16x16xf32, #tpu.memory_space<vmem>>, vector<16x16xf32>
    tpu.vector_store %arg8[%c0_31, %c0_32], %69 {strides = array<i32>} : memref<16x16xf32, #tpu.memory_space<vmem>>, vector<16x16xf32>,
    return
  }
  func.func @transform_0(%arg0: i32) -> (i32, i32) {
    %c0_i32 = arith.constant 0 : i32
    %c0_i32_0 = arith.constant 0 : i32
    return %arg0, %c0_i32 : i32, i32
  }
  func.func @transform_1(%arg0: i32) -> (i32, i32) {
    %c0_i32 = arith.constant 0 : i32
    %c0_i32_0 = arith.constant 0 : i32
    %c0_i32_1 = arith.constant 0 : i32
    return %c0_i32, %c0_i32_0 : i32, i32
  }
  func.func @transform_2(%arg0: i32) -> (i32, i32) {
    %c0_i32 = arith.constant 0 : i32
    %c0_i32_0 = arith.constant 0 : i32
    %c0_i32_1 = arith.constant 0 : i32
    return %c0_i32, %c0_i32_0 : i32, i32
  }
  func.func @transform_3(%arg0: i32) -> (i32, i32) {
    %c0_i32 = arith.constant 0 : i32
    %c0_i32_0 = arith.constant 0 : i32
    %c0_i32_1 = arith.constant 0 : i32
    return %c0_i32, %c0_i32_0 : i32, i32
  }
  func.func @transform_4(%arg0: i32) -> (i32, i32) {
    %c0_i32 = arith.constant 0 : i32
    %c0_i32_0 = arith.constant 0 : i32
    %c0_i32_1 = arith.constant 0 : i32
    return %c0_i32, %c0_i32_0 : i32, i32
  }
  func.func @transform_5(%arg0: i32) -> (i32, i32) {
    %c0_i32 = arith.constant 0 : i32
    %c0_i32_0 = arith.constant 0 : i32
    %c0_i32_1 = arith.constant 0 : i32
    return %c0_i32, %c0_i32_0 : i32, i32
  }
  func.func @transform_6(%arg0: i32) -> (i32, i32) {
    %c0_i32 = arith.constant 0 : i32
    %c0_i32_0 = arith.constant 0 : i32
    %c0_i32_1 = arith.constant 0 : i32
    return %c0_i32, %c0_i32_0 : i32, i32
  }
  func.func @transform_7(%arg0: i32) -> (i32, i32) {
    %c0_i32 = arith.constant 0 : i32
    %c0_i32_0 = arith.constant 0 : i32
    return %arg0, %c0_i32 : i32, i32
  }
}

</mosaic_0001>

<bundles_post_ra>
// kernel: tpu_custom_call.1
= control target key start
LH: loop header
LB: loop body
LE: loop exit
PB: predicated region body
PF: predicated region fallthrough
CT: control target
= control target key end

     0   :  { %s514_s0 = inlined_call_operand.vmem [shape: f32[16,32], index: 0, kind: input, shape index: {}]   ;;  %s515_s1 = inlined_call_operand.vmem [shape: f32[32,81], index: 1, kind: input, shape index: {}]   ;;  %s516_s2 = inlined_call_operand.vmem [shape: f32[1,81], index: 2, kind: input, shape index: {}]   ;;  %s517_s3 = inlined_call_operand.vmem [shape: f32[32,32], index: 3, kind: input, shape index: {}]   ;;  %s518_s4 = inlined_call_operand.vmem [shape: f32[1,32], index: 4, kind: input, shape index: {}]   ;;  %s519_s5 = inlined_call_operand.vmem [shape: f32[80,9], index: 5, kind: input, shape index: {}]   ;;  %s520_s6 = inlined_call_operand.vmem [shape: f32[1,9], index: 6, kind: input, shape index: {}]   ;;  %s521_s7 = inlined_call_operand.hbm [shape: f32[16,16], index: 7, kind: output, shape index: {}]  }
   0x1   :  { %v32_v0 = vld [vmem:[%s515_s1 + $0x18] sm:$0xff]  ;;  %v31_v1 = vld [vmem:[%s515_s1 + $0x10] sm:$0xff]  ;;  %v30_v2 = vld [vmem:[%s515_s1 + $0x8] sm:$0xff] }
   0x2   :  { %56 = vmatpush.msra.mxu0 %v32_v0 }
   0x4   :  { %57 = vmatpush.msra.mxu0 %v31_v1 }
   0x5   :  { %12 = vsyncpa [#allocation3], 0  ;;  %v29_v3 = vld [vmem:[%s515_s1] sm:$0xff]  ;;  %vm37_vm0 = vcmask 261120   ;;  %v28_v5 = vld [vmem:[%s514_s0 + $0x8] sm:$0xff]  ;;  %s354_s21 = smov 96  }
   0x6   :  { %58 = vmatpush.msra.mxu0 %v30_v2  ;;  %v27_v4 = vld [vmem:[%s514_s0] sm:$0xff]  ;;  %v72_v6 = vld [vmem:[%s517_s3 + $0x18] sm:$0xff]  ;;  %v71_v7 = vld [vmem:[%s517_s3 + $0x10] sm:$0xff]  ;;  %s355_s16 = smov 32   ;;  %vm122_vm1 = vcmask 523264   ;;  %vm139_vm2 = vcmask 654336  }
   0x7   :  { %99 = vmatpush.msra.mxu1 %v72_v6  ;;  %v70_v8 = vld [vmem:[%s517_s3 + $0x8] sm:$0xff]  ;;  %v69_v9 = vld [vmem:[%s517_s3] sm:$0xff]  ;;  %v132_v21 = vld [vmem:[%s519_s5 + $0x38] sm:$0xff]  ;;  %s358_s0 = smov 2   ;;  %vm249_vm11 = vcmask 31744   ;;  %vm252_vm12 = vcmask 39936  }
   0x8   :  { %59 = vmatpush.msra.mxu0 %v29_v3  ;;  %v317_v10 = vld [vmem:[%s516_s2] ss:$0 sm:$0xff]  ;;  %v134_v19 = vld [vmem:[%s519_s5 + $0x48] sm:$0xff]  ;;  %v131_v22 = vld [vmem:[%s519_s5 + $0x30] sm:$0xff]  ;;  %vm255_vm13 = vcmask 48128   ;;  %vm258_vm14 = vcmask 56320  }
   0x9   :  { %291 = vmatmul.msk.f32.vlgmr.msra.gmra.mxu0 %vm37_vm0, %v27_v4  ;;  %100 = vmatpush.msra.mxu1 %v71_v7  ;;  %v133_v20 = vld [vmem:[%s519_s5 + $0x40] sm:$0xff]  ;;  %v130_v23 = vld [vmem:[%s519_s5 + $0x28] sm:$0xff]  ;;  %v128_v25 = vld [vmem:[%s519_s5 + $0x18] sm:$0xff]  ;;  %vm261_vm15 = vcmask 64512   ;;  %s359_s20 = smov [#allocation2]   ;;  %s279_s22 = sshll.u32 %s521_s7, 4  ;;  %s280_s22 = int_to_ptr.hbm [resolvable:$true] %s279_s22 }
   0xa   :  { %152 = vmatpush.msra.mxu2 %v134_v19  ;;  %299 = vmatpush.msra.mxu3 %v134_v19  ;;  %v129_v24 = vld [vmem:[%s519_s5 + $0x20] sm:$0xff]  ;;  %v127_v26 = vld [vmem:[%s519_s5 + $0x10] sm:$0xff]  ;;  %v126_v27 = vld [vmem:[%s519_s5 + $0x8] sm:$0xff]  ;;  %s360_s23 = smov 128   ;;  %s361_s24 = smov 8  }
   0xb   :  { %101 = vmatpush.msra.mxu1 %v70_v8  ;;  %v318_v28 = vld [vmem:[%s518_s4] ss:$0 sm:$0xff] }
   0xc   :  { %153 = vmatpush.msra.mxu2 %v133_v20  ;;  %300 = vmatpush.msra.mxu3 %v133_v20  ;;  %v125_v35 = vld [vmem:[%s519_s5] sm:$0xff]  ;;  %s356_s5 = smov 126  }
   0xd   :  { %102 = vmatpush.msra.mxu1 %v69_v9  ;;  %v319_v42 = vld [vmem:[%s520_s6] ss:$0 sm:$0xff]  ;;  %s357_s6 = smov 57  }
   0xe   :  { %154 = vmatpush.msra.mxu2 %v132_v21  ;;  %301 = vmatpush.msra.mxu3 %v132_v21 }
  0x10   :  { %155 = vmatpush.msra.mxu2 %v131_v22  ;;  %302 = vmatpush.msra.mxu3 %v131_v22 }
  0x11   :  { %292 = vmatmul.msk.f32.gmra.mxu0 %vm37_vm0, %v28_v5 }
  0x12   :  { %156 = vmatpush.msra.mxu2 %v130_v23  ;;  %303 = vmatpush.msra.mxu3 %v130_v23 }
  0x14   :  { %157 = vmatpush.msra.mxu2 %v129_v24  ;;  %304 = vmatpush.msra.mxu3 %v129_v24 }
  0x16   :  { %158 = vmatpush.msra.mxu2 %v128_v25  ;;  %305 = vmatpush.msra.mxu3 %v128_v25 }
  0x18   :  { %159 = vmatpush.msra.mxu2 %v127_v26  ;;  %306 = vmatpush.msra.mxu3 %v127_v26 }
  0x1a   :  { %160 = vmatpush.msra.mxu2 %v126_v27  ;;  %307 = vmatpush.msra.mxu3 %v126_v27 }
  0x1c   :  { %161 = vmatpush.msra.mxu2 %v125_v35  ;;  %308 = vmatpush.msra.mxu3 %v125_v35 }
  0x86   :  { %v61_v11 = vpop.f32.mrf.mxu0 }
  0x87   :  { %v437_v12 = vadd.f32 %v317_v10, %v61_v11 }
  0x89   :  { %v67_v13 = vmax.f32 %v437_v12, 0.0 }
  0x8b   :  { %79 = vrot.lane.b32.xlu0 %v67_v13, %s354_s21 }
  0x8e   :  { %v64_v14 = vpop.f32.mrf.mxu0 }
  0x8f   :  { %v440_v15 = vadd.f32 %v317_v10, %v64_v14 }
  0x91   :  { %v68_v16 = vmax.f32 %v440_v15, 0.0 }
  0x93   :  { %81 = vrot.lane.b32.xlu0 %v68_v16, %s354_s21  ;;  %s277_s21 = sshll.u32 %s359_s20, 4  ;;  %s278_s21 = int_to_ptr.vmem [resolvable:$true] %s277_s21 }
  0xfd   :  { %v80_v17 = vpop.permute.xlu0 %79 }
  0xfe   :  { %293 = vmatmul.msk.f32.vlgmr.msra.gmra.mxu1 %vm37_vm0, %v80_v17 }
 0x105   :  { %v82_v18 = vpop.permute.xlu0 %81 }
 0x106   :  { %294 = vmatmul.msk.f32.gmra.mxu1 %vm37_vm0, %v82_v18 }
 0x17b   :  { %v104_v29 = vpop.f32.mrf.mxu1 }
 0x17c   :  { %v105_v30 = vadd.f32 %v318_v28, %v104_v29 }
 0x17e   :  { %v110_v31 = vmax.f32 %v105_v30, 0.0 }
 0x180   :  { %114 = vrot.lane.b32.xlu1 %v110_v31, %s355_s16 }
 0x183   :  { %v107_v32 = vpop.f32.mrf.mxu1 }
 0x184   :  { %v108_v33 = vadd.f32 %v318_v28, %v107_v32 }
 0x186   :  { %v111_v34 = vmax.f32 %v108_v33, 0.0 }
 0x188   :  { %116 = vrot.lane.b32.xlu1 %v111_v34, %s355_s16 }
 0x1f2   :  { %v115_v36 = vpop.permute.xlu1 %114 }
 0x1f3   :  { %v120_v37 = vsel %vm37_vm0, %v67_v13, %v115_v36 }
 0x1f4   :  { %v123_v38 = vsel %vm122_vm1, %v120_v37, %v67_v13 }
 0x1f5   :  { %295 = vmatmul.msk.f32.vlgmr.msra.gmra.mxu2 %vm139_vm2, %v123_v38 }
 0x1fa   :  { %v117_v39 = vpop.permute.xlu1 %116 }
 0x1fb   :  { %v121_v40 = vsel %vm37_vm0, %v68_v16, %v117_v39  ;;  %vm264_vm0 = vcmask 72704  }
 0x1fc   :  { %v124_v41 = vsel %vm122_vm1, %v121_v40, %v68_v16  ;;  %vm267_vm1 = vcmask 80896  }
 0x1fd   :  { %296 = vmatmul.msk.f32.vlgmr.msra.gmra.mxu3 %vm139_vm2, %v124_v41  ;;  %vm270_vm2 = vcmask 130048  }
 0x278   :  { %v163_v43 = vpop.f32.mrf.mxu2 }
 0x279   :  { %v483_v44 = vadd.f32 %v319_v42, %v163_v43 }
 0x27b   :  { %v297_v45 = vmul.f32 -1.442695, %v483_v44 }
 0x27d   :  { %320 = vpow2.f32 %v297_v45 }
 0x280   :  { %v166_v46 = vpop.f32.mrf.mxu3 }
 0x281   :  { %v486_v47 = vadd.f32 %v319_v42, %v166_v46 }
 0x283   :  { %v321_v48 = vpop.eup %320  ;;  %v298_v49 = vmul.f32 -1.442695, %v486_v47 }
 0x284   :  { %v175_v50 = vadd.f32 1.0, %v321_v48 }
 0x285   :  { %322 = vpow2.f32 %v298_v49 }
 0x286   :  { %324 = vrcp.f32 %v175_v50  ;;  %v188_v56 = vand.u32 2147483648, %v175_v50  ;;  %v186_v58 = vand.u32 2147483647, %v175_v50  ;;  %vm182_vm4 = vweird.f32 %v175_v50 }
 0x288   :  { %v189_v61 = vor.u32 1.1754944e-38, %v188_v56  ;;  %vm187_vm6 = vcmp.eq.f32.partialorder %v186_v58, 8.507059e+37 }
 0x28b   :  { %v323_v51 = vpop.eup %322 }
 0x28c   :  { %v325_v52 = vpop.eup %324  ;;  %v176_v53 = vadd.f32 1.0, %v323_v51 }
 0x28d   :  { %v178_v54 = vmul.f32 %v325_v52, %v175_v50  ;;  %vm183_vm3 = vweird.f32 %v325_v52 }
 0x28e   :  { %326 = vrcp.f32 %v176_v53  ;;  %vm184_vm5 = vmor %vm182_vm4, %vm183_vm3  ;;  %v203_v3 = vand.u32 2147483648, %v176_v53  ;;  %v201_v5 = vand.u32 2147483647, %v176_v53  ;;  %vm197_vm8 = vweird.f32 %v176_v53 }
 0x28f   :  { %v179_v55 = vsub.f32 1.0, %v178_v54 }
 0x290   :  { %v204_v7 = vor.u32 1.1754944e-38, %v203_v3  ;;  %vm202_vm10 = vcmp.eq.f32.partialorder %v201_v5, 8.507059e+37 }
 0x291   :  { %v180_v57 = vmul.f32 %v325_v52, %v179_v55 }
 0x293   :  { %v181_v59 = vadd.f32 %v325_v52, %v180_v57 }
 0x294   :  { %v327_v60 = vpop.eup %326 }
 0x295   :  { %v185_v62 = vsel %vm184_vm5, %v325_v52, %v181_v59  ;;  %v193_v63 = vmul.f32 %v327_v60, %v176_v53  ;;  %vm198_vm7 = vweird.f32 %v327_v60 }
 0x296   :  { %v190_v0 = vsel %vm187_vm6, %v189_v61, %v185_v62  ;;  %vm199_vm9 = vmor %vm197_vm8, %vm198_vm7 }
 0x297   :  { %v207_v1 = vmul.f32 0.5, %v190_v0  ;;  %v194_v2 = vsub.f32 1.0, %v193_v63 }
 0x299   :  { %211 = vrot.lane.b32.xlu2 %v207_v1, %s356_s5  ;;  %v195_v4 = vmul.f32 %v327_v60, %v194_v2 }
 0x29b   :  { %v196_v6 = vadd.f32 %v327_v60, %v195_v4 }
 0x29d   :  { %v200_v8 = vsel %vm199_vm9, %v327_v60, %v196_v6 }
 0x29e   :  { %v205_v9 = vsel %vm202_vm10, %v204_v7, %v200_v8 }
 0x29f   :  { %v208_v10 = vmul.f32 0.5, %v205_v9 }
 0x2a1   :  { %213 = vrot.lane.b32.xlu2 %v208_v10, %s356_s5 }
 0x2a9   :  { %243 = vrot.lane.b32.xlu2 %v437_v12, %s357_s6 }
 0x2f3   :  { %v212_v11 = vpop.permute.xlu2 %211 }
 0x2f4   :  { %v217_v13 = vsub.f32 %v190_v0, %v212_v11  ;;  %v223_v14 = vadd.f32 %v212_v11, %v190_v0 }
 0x2f6   :  { %v219_v16 = vmax.f32 %v217_v13, 0.0  ;;  %v225_v17 = vmax.f32 %v223_v14, 0.0 }
 0x2f8   :  { %v221_v18 = vmin.f32 %v219_v16, 1.0  ;;  %v227_v19 = vmin.f32 %v225_v17, 1.0 }
 0x2fa   :  { %v229_v20 = vadd.f32 0.01, %v221_v18  ;;  %v250_v30 = vsel %vm249_vm11, %v483_v44, %v221_v18 }
 0x2fb   :  { %v214_v21 = vpop.permute.xlu2 %213  ;;  %v253_v31 = vsel %vm252_vm12, %v250_v30, %v221_v18 }
 0x2fc   :  { %v218_v22 = vsub.f32 %v205_v9, %v214_v21  ;;  %v224_v23 = vadd.f32 %v214_v21, %v205_v9  ;;  %v231_v24 = vmax.f32 %v227_v19, %v229_v20 }
 0x2fe   :  { %v220_v25 = vmax.f32 %v218_v22, 0.0  ;;  %v226_v26 = vmax.f32 %v224_v23, 0.0  ;;  %235 = vrot.lane.b32.xlu0 %v231_v24, %s358_s0 }
 0x300   :  { %v222_v27 = vmin.f32 %v220_v25, 1.0  ;;  %v228_v28 = vmin.f32 %v226_v26, 1.0 }
 0x302   :  { %v230_v29 = vadd.f32 0.01, %v222_v27  ;;  %v251_v37 = vsel %vm249_vm11, %v486_v47, %v222_v27 }
 0x303   :  { %v244_v35 = vpop.permute.xlu2 %243  ;;  %v254_v39 = vsel %vm252_vm12, %v251_v37, %v222_v27 }
 0x304   :  { %v232_v12 = vmax.f32 %v228_v28, %v230_v29 }
 0x306   :  { %245 = vrot.lane.b32.xlu0 %v440_v15, %s357_s6  ;;  %237 = vrot.lane.b32.xlu1 %v232_v12, %s358_s0 }
 0x370   :  { %v236_v32 = vpop.permute.xlu0 %235 }
 0x371   :  { %v256_v33 = vsel %vm255_vm13, %v253_v31, %v236_v32 }
 0x372   :  { %v259_v34 = vsel %vm258_vm14, %v256_v33, %v236_v32 }
 0x373   :  { %v262_v15 = vsel %vm261_vm15, %v259_v34, %v483_v44 }
 0x374   :  { %v265_v36 = vsel %vm264_vm0, %v262_v15, %v244_v35 }
 0x375   :  { %v268_v38 = vsel %vm267_vm1, %v265_v36, 0.0 }
 0x376   :  { %271 = vst.msk [vmem:[#allocation2] sm:$0xff] %vm270_vm2, %v268_v38 }
 0x378   :  { %v238_v40 = vpop.permute.xlu1 %237  ;;  %v246_v44 = vpop.permute.xlu0 %245 }
 0x379   :  { %v257_v41 = vsel %vm255_vm13, %v254_v39, %v238_v40 }
 0x37a   :  { %v260_v42 = vsel %vm258_vm14, %v257_v41, %v238_v40 }
 0x37b   :  { %v263_v43 = vsel %vm261_vm15, %v260_v42, %v486_v47 }
 0x37c   :  { %v266_v45 = vsel %vm264_vm0, %v263_v43, %v246_v44 }
 0x37d   :  { %v269_v46 = vsel %vm267_vm1, %v266_v45, 0.0 }
 0x37e   :  { %272 = vst.msk [vmem:[#allocation2 + $0x8] sm:$0xff] %vm270_vm2, %v269_v46 }
 0x37f   :  { %285 = dma.vmem_to_hbm [thread:$0]  %s278_s21, 256, %s280_s22, [#allocation3], %s360_s23, %s360_s23, %s361_s24  }
 0x380   :  { %352 = dma.done.wait [#allocation3], 256  }
 0x381   :  { %353 = vsyncadd [#allocation3], 4294967040 }
 0x382   :  { %290 = vsyncpa [#allocation3], 1 }

// kernel: tpu_custom_call.1
= control target key start
LH: loop header
LB: loop body
LE: loop exit
PB: predicated region body
PF: predicated region fallthrough
CT: control target
= control target key end

     0   :  { %s514_s0 = inlined_call_operand.vmem [shape: f32[16,32], index: 0, kind: input, shape index: {}]   ;;  %s515_s1 = inlined_call_operand.vmem [shape: f32[32,81], index: 1, kind: input, shape index: {}]   ;;  %s516_s2 = inlined_call_operand.vmem [shape: f32[1,81], index: 2, kind: input, shape index: {}]   ;;  %s517_s3 = inlined_call_operand.vmem [shape: f32[32,32], index: 3, kind: input, shape index: {}]   ;;  %s518_s4 = inlined_call_operand.vmem [shape: f32[1,32], index: 4, kind: input, shape index: {}]   ;;  %s519_s5 = inlined_call_operand.vmem [shape: f32[80,9], index: 5, kind: input, shape index: {}]   ;;  %s520_s6 = inlined_call_operand.vmem [shape: f32[1,9], index: 6, kind: input, shape index: {}]   ;;  %s521_s7 = inlined_call_operand.hbm [shape: f32[16,16], index: 7, kind: output, shape index: {}]  }
   0x1   :  { %v32_v0 = vld [vmem:[%s515_s1 + $0x18] sm:$0xff]  ;;  %v31_v1 = vld [vmem:[%s515_s1 + $0x10] sm:$0xff]  ;;  %v30_v2 = vld [vmem:[%s515_s1 + $0x8] sm:$0xff] }
   0x2   :  { %56 = vmatpush.msra.mxu0 %v32_v0 }
   0x4   :  { %57 = vmatpush.msra.mxu0 %v31_v1 }
   0x5   :  { %12 = vsyncpa [#allocation3], 0  ;;  %v29_v3 = vld [vmem:[%s515_s1] sm:$0xff]  ;;  %vm37_vm0 = vcmask 261120   ;;  %v28_v5 = vld [vmem:[%s514_s0 + $0x8] sm:$0xff]  ;;  %s354_s21 = smov 96  }
   0x6   :  { %58 = vmatpush.msra.mxu0 %v30_v2  ;;  %v27_v4 = vld [vmem:[%s514_s0] sm:$0xff]  ;;  %v72_v6 = vld [vmem:[%s517_s3 + $0x18] sm:$0xff]  ;;  %v71_v7 = vld [vmem:[%s517_s3 + $0x10] sm:$0xff]  ;;  %s355_s16 = smov 32   ;;  %vm122_vm1 = vcmask 523264   ;;  %vm139_vm2 = vcmask 654336  }
   0x7   :  { %99 = vmatpush.msra.mxu1 %v72_v6  ;;  %v70_v8 = vld [vmem:[%s517_s3 + $0x8] sm:$0xff]  ;;  %v69_v9 = vld [vmem:[%s517_s3] sm:$0xff]  ;;  %v132_v21 = vld [vmem:[%s519_s5 + $0x38] sm:$0xff]  ;;  %s358_s0 = smov 2   ;;  %vm249_vm11 = vcmask 31744   ;;  %vm252_vm12 = vcmask 39936  }
   0x8   :  { %59 = vmatpush.msra.mxu0 %v29_v3  ;;  %v317_v10 = vld [vmem:[%s516_s2] ss:$0 sm:$0xff]  ;;  %v134_v19 = vld [vmem:[%s519_s5 + $0x48] sm:$0xff]  ;;  %v131_v22 = vld [vmem:[%s519_s5 + $0x30] sm:$0xff]  ;;  %vm255_vm13 = vcmask 48128   ;;  %vm258_vm14 = vcmask 56320  }
   0x9   :  { %291 = vmatmul.msk.f32.vlgmr.msra.gmra.mxu0 %vm37_vm0, %v27_v4  ;;  %100 = vmatpush.msra.mxu1 %v71_v7  ;;  %v133_v20 = vld [vmem:[%s519_s5 + $0x40] sm:$0xff]  ;;  %v130_v23 = vld [vmem:[%s519_s5 + $0x28] sm:$0xff]  ;;  %v128_v25 = vld [vmem:[%s519_s5 + $0x18] sm:$0xff]  ;;  %vm261_vm15 = vcmask 64512   ;;  %s359_s20 = smov [#allocation2]   ;;  %s279_s22 = sshll.u32 %s521_s7, 4  ;;  %s280_s22 = int_to_ptr.hbm [resolvable:$true] %s279_s22 }
   0xa   :  { %152 = vmatpush.msra.mxu2 %v134_v19  ;;  %299 = vmatpush.msra.mxu3 %v134_v19  ;;  %v129_v24 = vld [vmem:[%s519_s5 + $0x20] sm:$0xff]  ;;  %v127_v26 = vld [vmem:[%s519_s5 + $0x10] sm:$0xff]  ;;  %v126_v27 = vld [vmem:[%s519_s5 + $0x8] sm:$0xff]  ;;  %s360_s23 = smov 128   ;;  %s361_s24 = smov 8  }
   0xb   :  { %101 = vmatpush.msra.mxu1 %v70_v8  ;;  %v318_v28 = vld [vmem:[%s518_s4] ss:$0 sm:$0xff] }
   0xc   :  { %153 = vmatpush.msra.mxu2 %v133_v20  ;;  %300 = vmatpush.msra.mxu3 %v133_v20  ;;  %v125_v35 = vld [vmem:[%s519_s5] sm:$0xff]  ;;  %s356_s5 = smov 126  }
   0xd   :  { %102 = vmatpush.msra.mxu1 %v69_v9  ;;  %v319_v42 = vld [vmem:[%s520_s6] ss:$0 sm:$0xff]  ;;  %s357_s6 = smov 57  }
   0xe   :  { %154 = vmatpush.msra.mxu2 %v132_v21  ;;  %301 = vmatpush.msra.mxu3 %v132_v21 }
  0x10   :  { %155 = vmatpush.msra.mxu2 %v131_v22  ;;  %302 = vmatpush.msra.mxu3 %v131_v22 }
  0x11   :  { %292 = vmatmul.msk.f32.gmra.mxu0 %vm37_vm0, %v28_v5 }
  0x12   :  { %156 = vmatpush.msra.mxu2 %v130_v23  ;;  %303 = vmatpush.msra.mxu3 %v130_v23 }
  0x14   :  { %157 = vmatpush.msra.mxu2 %v129_v24  ;;  %304 = vmatpush.msra.mxu3 %v129_v24 }
  0x16   :  { %158 = vmatpush.msra.mxu2 %v128_v25  ;;  %305 = vmatpush.msra.mxu3 %v128_v25 }
  0x18   :  { %159 = vmatpush.msra.mxu2 %v127_v26  ;;  %306 = vmatpush.msra.mxu3 %v127_v26 }
  0x1a   :  { %160 = vmatpush.msra.mxu2 %v126_v27  ;;  %307 = vmatpush.msra.mxu3 %v126_v27 }
  0x1c   :  { %161 = vmatpush.msra.mxu2 %v125_v35  ;;  %308 = vmatpush.msra.mxu3 %v125_v35 }
  0x86   :  { %v61_v11 = vpop.f32.mrf.mxu0 }
  0x87   :  { %v437_v12 = vadd.f32 %v317_v10, %v61_v11 }
  0x89   :  { %v67_v13 = vmax.f32 %v437_v12, 0.0 }
  0x8b   :  { %79 = vrot.lane.b32.xlu0 %v67_v13, %s354_s21 }
  0x8e   :  { %v64_v14 = vpop.f32.mrf.mxu0 }
  0x8f   :  { %v440_v15 = vadd.f32 %v317_v10, %v64_v14 }
  0x91   :  { %v68_v16 = vmax.f32 %v440_v15, 0.0 }
  0x93   :  { %81 = vrot.lane.b32.xlu0 %v68_v16, %s354_s21  ;;  %s277_s21 = sshll.u32 %s359_s20, 4  ;;  %s278_s21 = int_to_ptr.vmem [resolvable:$true] %s277_s21 }
  0xfd   :  { %v80_v17 = vpop.permute.xlu0 %79 }
  0xfe   :  { %293 = vmatmul.msk.f32.vlgmr.msra.gmra.mxu1 %vm37_vm0, %v80_v17 }
 0x105   :  { %v82_v18 = vpop.permute.xlu0 %81 }
 0x106   :  { %294 = vmatmul.msk.f32.gmra.mxu1 %vm37_vm0, %v82_v18 }
 0x17b   :  { %v104_v29 = vpop.f32.mrf.mxu1 }
 0x17c   :  { %v105_v30 = vadd.f32 %v318_v28, %v104_v29 }
 0x17e   :  { %v110_v31 = vmax.f32 %v105_v30, 0.0 }
 0x180   :  { %114 = vrot.lane.b32.xlu1 %v110_v31, %s355_s16 }
 0x183   :  { %v107_v32 = vpop.f32.mrf.mxu1 }
 0x184   :  { %v108_v33 = vadd.f32 %v318_v28, %v107_v32 }
 0x186   :  { %v111_v34 = vmax.f32 %v108_v33, 0.0 }
 0x188   :  { %116 = vrot.lane.b32.xlu1 %v111_v34, %s355_s16 }
 0x1f2   :  { %v115_v36 = vpop.permute.xlu1 %114 }
 0x1f3   :  { %v120_v37 = vsel %vm37_vm0, %v67_v13, %v115_v36 }
 0x1f4   :  { %v123_v38 = vsel %vm122_vm1, %v120_v37, %v67_v13 }
 0x1f5   :  { %295 = vmatmul.msk.f32.vlgmr.msra.gmra.mxu2 %vm139_vm2, %v123_v38 }
 0x1fa   :  { %v117_v39 = vpop.permute.xlu1 %116 }
 0x1fb   :  { %v121_v40 = vsel %vm37_vm0, %v68_v16, %v117_v39  ;;  %vm264_vm0 = vcmask 72704  }
 0x1fc   :  { %v124_v41 = vsel %vm122_vm1, %v121_v40, %v68_v16  ;;  %vm267_vm1 = vcmask 80896  }
 0x1fd   :  { %296 = vmatmul.msk.f32.vlgmr.msra.gmra.mxu3 %vm139_vm2, %v124_v41  ;;  %vm270_vm2 = vcmask 130048  }
 0x278   :  { %v163_v43 = vpop.f32.mrf.mxu2 }
 0x279   :  { %v483_v44 = vadd.f32 %v319_v42, %v163_v43 }
 0x27b   :  { %v297_v45 = vmul.f32 -1.442695, %v483_v44 }
 0x27d   :  { %320 = vpow2.f32 %v297_v45 }
 0x280   :  { %v166_v46 = vpop.f32.mrf.mxu3 }
 0x281   :  { %v486_v47 = vadd.f32 %v319_v42, %v166_v46 }
 0x283   :  { %v321_v48 = vpop.eup %320  ;;  %v298_v49 = vmul.f32 -1.442695, %v486_v47 }
 0x284   :  { %v175_v50 = vadd.f32 1.0, %v321_v48 }
 0x285   :  { %322 = vpow2.f32 %v298_v49 }
 0x286   :  { %324 = vrcp.f32 %v175_v50  ;;  %v188_v56 = vand.u32 2147483648, %v175_v50  ;;  %v186_v58 = vand.u32 2147483647, %v175_v50  ;;  %vm182_vm4 = vweird.f32 %v175_v50 }
 0x288   :  { %v189_v61 = vor.u32 1.1754944e-38, %v188_v56  ;;  %vm187_vm6 = vcmp.eq.f32.partialorder %v186_v58, 8.507059e+37 }
 0x28b   :  { %v323_v51 = vpop.eup %322 }
 0x28c   :  { %v325_v52 = vpop.eup %324  ;;  %v176_v53 = vadd.f32 1.0, %v323_v51 }
 0x28d   :  { %v178_v54 = vmul.f32 %v325_v52, %v175_v50  ;;  %vm183_vm3 = vweird.f32 %v325_v52 }
 0x28e   :  { %326 = vrcp.f32 %v176_v53  ;;  %vm184_vm5 = vmor %vm182_vm4, %vm183_vm3  ;;  %v203_v3 = vand.u32 2147483648, %v176_v53  ;;  %v201_v5 = vand.u32 2147483647, %v176_v53  ;;  %vm197_vm8 = vweird.f32 %v176_v53 }
 0x28f   :  { %v179_v55 = vsub.f32 1.0, %v178_v54 }
 0x290   :  { %v204_v7 = vor.u32 1.1754944e-38, %v203_v3  ;;  %vm202_vm10 = vcmp.eq.f32.partialorder %v201_v5, 8.507059e+37 }
 0x291   :  { %v180_v57 = vmul.f32 %v325_v52, %v179_v55 }
 0x293   :  { %v181_v59 = vadd.f32 %v325_v52, %v180_v57 }
 0x294   :  { %v327_v60 = vpop.eup %326 }
 0x295   :  { %v185_v62 = vsel %vm184_vm5, %v325_v52, %v181_v59  ;;  %v193_v63 = vmul.f32 %v327_v60, %v176_v53  ;;  %vm198_vm7 = vweird.f32 %v327_v60 }
 0x296   :  { %v190_v0 = vsel %vm187_vm6, %v189_v61, %v185_v62  ;;  %vm199_vm9 = vmor %vm197_vm8, %vm198_vm7 }
 0x297   :  { %v207_v1 = vmul.f32 0.5, %v190_v0  ;;  %v194_v2 = vsub.f32 1.0, %v193_v63 }
 0x299   :  { %211 = vrot.lane.b32.xlu2 %v207_v1, %s356_s5  ;;  %v195_v4 = vmul.f32 %v327_v60, %v194_v2 }
 0x29b   :  { %v196_v6 = vadd.f32 %v327_v60, %v195_v4 }
 0x29d   :  { %v200_v8 = vsel %vm199_vm9, %v327_v60, %v196_v6 }
 0x29e   :  { %v205_v9 = vsel %vm202_vm10, %v204_v7, %v200_v8 }
 0x29f   :  { %v208_v10 = vmul.f32 0.5, %v205_v9 }
 0x2a1   :  { %213 = vrot.lane.b32.xlu2 %v208_v10, %s356_s5 }
 0x2a9   :  { %243 = vrot.lane.b32.xlu2 %v437_v12, %s357_s6 }
 0x2f3   :  { %v212_v11 = vpop.permute.xlu2 %211 }
 0x2f4   :  { %v217_v13 = vsub.f32 %v190_v0, %v212_v11  ;;  %v223_v14 = vadd.f32 %v212_v11, %v190_v0 }
 0x2f6   :  { %v219_v16 = vmax.f32 %v217_v13, 0.0  ;;  %v225_v17 = vmax.f32 %v223_v14, 0.0 }
 0x2f8   :  { %v221_v18 = vmin.f32 %v219_v16, 1.0  ;;  %v227_v19 = vmin.f32 %v225_v17, 1.0 }
 0x2fa   :  { %v229_v20 = vadd.f32 0.01, %v221_v18  ;;  %v250_v30 = vsel %vm249_vm11, %v483_v44, %v221_v18 }
 0x2fb   :  { %v214_v21 = vpop.permute.xlu2 %213  ;;  %v253_v31 = vsel %vm252_vm12, %v250_v30, %v221_v18 }
 0x2fc   :  { %v218_v22 = vsub.f32 %v205_v9, %v214_v21  ;;  %v224_v23 = vadd.f32 %v214_v21, %v205_v9  ;;  %v231_v24 = vmax.f32 %v227_v19, %v229_v20 }
 0x2fe   :  { %v220_v25 = vmax.f32 %v218_v22, 0.0  ;;  %v226_v26 = vmax.f32 %v224_v23, 0.0  ;;  %235 = vrot.lane.b32.xlu0 %v231_v24, %s358_s0 }
 0x300   :  { %v222_v27 = vmin.f32 %v220_v25, 1.0  ;;  %v228_v28 = vmin.f32 %v226_v26, 1.0 }
 0x302   :  { %v230_v29 = vadd.f32 0.01, %v222_v27  ;;  %v251_v37 = vsel %vm249_vm11, %v486_v47, %v222_v27 }
 0x303   :  { %v244_v35 = vpop.permute.xlu2 %243  ;;  %v254_v39 = vsel %vm252_vm12, %v251_v37, %v222_v27 }
 0x304   :  { %v232_v12 = vmax.f32 %v228_v28, %v230_v29 }
 0x306   :  { %245 = vrot.lane.b32.xlu0 %v440_v15, %s357_s6  ;;  %237 = vrot.lane.b32.xlu1 %v232_v12, %s358_s0 }
 0x370   :  { %v236_v32 = vpop.permute.xlu0 %235 }
 0x371   :  { %v256_v33 = vsel %vm255_vm13, %v253_v31, %v236_v32 }
 0x372   :  { %v259_v34 = vsel %vm258_vm14, %v256_v33, %v236_v32 }
 0x373   :  { %v262_v15 = vsel %vm261_vm15, %v259_v34, %v483_v44 }
 0x374   :  { %v265_v36 = vsel %vm264_vm0, %v262_v15, %v244_v35 }
 0x375   :  { %v268_v38 = vsel %vm267_vm1, %v265_v36, 0.0 }
 0x376   :  { %271 = vst.msk [vmem:[#allocation2] sm:$0xff] %vm270_vm2, %v268_v38 }
 0x378   :  { %v238_v40 = vpop.permute.xlu1 %237  ;;  %v246_v44 = vpop.permute.xlu0 %245 }
 0x379   :  { %v257_v41 = vsel %vm255_vm13, %v254_v39, %v238_v40 }
 0x37a   :  { %v260_v42 = vsel %vm258_vm14, %v257_v41, %v238_v40 }
 0x37b   :  { %v263_v43 = vsel %vm261_vm15, %v260_v42, %v486_v47 }
 0x37c   :  { %v266_v45 = vsel %vm264_vm0, %v263_v43, %v246_v44 }
 0x37d   :  { %v269_v46 = vsel %vm267_vm1, %v266_v45, 0.0 }
 0x37e   :  { %272 = vst.msk [vmem:[#allocation2 + $0x8] sm:$0xff] %vm270_vm2, %v269_v46 }
 0x37f   :  { %285 = dma.vmem_to_hbm [thread:$0]  %s278_s21, 256, %s280_s22, [#allocation3], %s360_s23, %s360_s23, %s361_s24  }
 0x380   :  { %352 = dma.done.wait [#allocation3], 256  }
 0x381   :  { %353 = vsyncadd [#allocation3], 4294967040 }
 0x382   :  { %290 = vsyncpa [#allocation3], 1 }

</bundles_post_ra>
